<compile_context>
chip_gen: v5e
topology: v5e:2x2
jax: 0.10.0
libtpu: 0.0.40
codegen_flags: <defaults>
</compile_context>

<pallas_src>
import jax
import jax.numpy as jnp
from jax import lax
from jax.experimental import pallas as pl
from jax.experimental.pallas import tpu as pltpu

MASK_VALUE = -1000.0


def _round_up(x, m):
    return ((x + m - 1) // m) * m


def _largest_tile(dim, unit, cap):
    """Largest multiple of `unit` that divides `dim` and is <= min(dim, cap)."""
    best = unit
    t = unit
    limit = min(dim, cap)
    while t <= limit:
        if dim % t == 0:
            best = t
        t += unit
    return best


def _sublane_multiple(dtype):
    itemsize = jnp.dtype(dtype).itemsize
    return {4: 8, 2: 16, 1: 32}.get(itemsize, 8)


def _vmem_capacity_bytes():
    try:
        info = pltpu.get_tpu_info()
        cap = getattr(info, "vmem_capacity_bytes", None)
        if cap:
            return int(cap)
    except Exception:
        pass
    return 64 * 1024 * 1024   # conservative fallback (v7x per-TC VMEM)


# ----------------------------------------------------------------------------
# Kernels
# ----------------------------------------------------------------------------
def _dot_tile(x_ref, w_ref):
    # x tile [tm, tk] contracted with weight tile [tn, tk] along the feature
    # (last) axis of both -> [tm, tn]; f32 accumulation on the MXU.  No
    # materialized transpose of the weight anywhere.
    return lax.dot_general(
        x_ref[...], w_ref[...],
        dimension_numbers=(((1,), (1,)), ((), ())),
        preferred_element_type=jnp.float32)


def _linear_kernel(x_ref, w_ref, bias_ref, o_ref, acc_ref):
    k = pl.program_id(2)
    partial = _dot_tile(x_ref, w_ref)

    @pl.when(k == 0)
    def _():
        # Bias folded into the accumulator init: no separate zero-fill and no
        # extra VPU pass at writeback.
        acc_ref[...] = partial + bias_ref[...]

    @pl.when(k > 0)
    def _():
        acc_ref[...] += partial

    @pl.when(k == pl.num_programs(2) - 1)
    def _():
        o_ref[...] = acc_ref[...].astype(o_ref.dtype)


def _linear_masked_kernel(x_ref, w_ref, scale_ref, offset_ref, o_ref, acc_ref):
    k = pl.program_id(2)
    partial = _dot_tile(x_ref, w_ref)

    @pl.when(k == 0)
    def _():
        acc_ref[...] = partial

    @pl.when(k > 0)
    def _():
        acc_ref[...] += partial

    @pl.when(k == pl.num_programs(2) - 1)
    def _():
        # scale = 1.0 (active) / 0.0 (inactive); offset = bias / -1000.
        # acc*1 + bias == linear output; acc*0 + (-1000) == masked_fill value.
        o_ref[...] = (acc_ref[...] * scale_ref[...]
                      + offset_ref[...]).astype(o_ref.dtype)


# ----------------------------------------------------------------------------
# Wrapper
# ----------------------------------------------------------------------------
def incremental_classifier_forward(x, weight, bias, active_units=None,
                                   masking=False, compute_dtype=None):
    """Forward of IncrementalClassifier.

    x: [B, D], weight: [N, D], bias: [N], active_units: [N] int8 (if masking).
    compute_dtype: optional cast for x/weight (e.g. jnp.bfloat16 on v5e);
    accumulation stays f32.  Returns [B, N] in x.dtype.
    """
    B, D = x.shape
    N, D_w = weight.shape
    assert D == D_w, "weight in_features mismatch"
    out_dtype = x.dtype

    if compute_dtype is not None:
        x = x.astype(compute_dtype)
        weight = weight.astype(compute_dtype)

    # --- lane/sublane rounding (only; no tile-multiple padding) --------------
    sub = max(_sublane_multiple(x.dtype), _sublane_multiple(out_dtype))
    B_pad = _round_up(B, sub)
    N_pad = _round_up(N, 128)
    D_pad = _round_up(D, 128)

    # --- VMEM budget ----------------------------------------------------------
    vmem_cap = _vmem_capacity_bytes()
    budget = max(16 * 1024 * 1024, min((vmem_cap * 3) // 4, 96 * 1024 * 1024))

    in_sz = jnp.dtype(x.dtype).itemsize
    w_sz = jnp.dtype(weight.dtype).itemsize
    out_sz = jnp.dtype(out_dtype).itemsize
    n_rows = 2 if masking else 1

    # --- tile selection: big tiles that are divisors of the rounded dims -----
    # tm as large as possible -> fewest batch tiles -> weight streamed fewest
    # times.  tn/tk large -> big contiguous weight DMAs, few grid steps.
    tm = _largest_tile(B_pad, sub, 512)
    tn = _largest_tile(N_pad, 128, 1024)
    tk = _largest_tile(D_pad, 128, 2048)

    def _need(tm_, tn_, tk_):
        return (2 * tm_ * tk_ * in_sz          # x tile, double-buffered
                + 2 * tn_ * tk_ * w_sz         # weight tile, double-buffered
                + 2 * n_rows * tn_ * 4         # f32 bias / scale / offset rows
                + 2 * tm_ * tn_ * out_sz       # output tile, double-buffered
                + tm_ * tn_ * 4)               # f32 accumulator scratch

    # Shrink (rarely needed at these caps) to stay well inside the budget.
    while _need(tm, tn, tk) > (budget * 4) // 5:
        if tk > 128:
            tk = _largest_tile(D_pad, 128, max(128, tk // 2))
        elif tn > 128:
            tn = _largest_tile(N_pad, 128, max(128, tn // 2))
        elif tm > sub:
            tm = _largest_tile(B_pad, sub, max(sub, tm // 2))
        else:
            break

    # v7x megacore: guarantee >=2 blocks on a "parallel" axis so the second
    # TensorCore gets work.  No effect on v5e/v6e (1 TC/chip).
    if B_pad // tm == 1 and N_pad // tn == 1:
        if N_pad > 128:
            tn = _largest_tile(N_pad, 128, tn - 1)   # largest proper divisor
        elif B_pad > sub:
            tm = _largest_tile(B_pad, sub, tm - 1)

    # --- pad operands to the lane/sublane-rounded shapes only -----------------
    if (B_pad, D_pad) != (B, D):
        x = jnp.pad(x, ((0, B_pad - B), (0, D_pad - D)))
    if (N_pad, D_pad) != (N, D):
        weight = jnp.pad(weight, ((0, N_pad - N), (0, D_pad - D)))

    grid = (B_pad // tm, N_pad // tn, D_pad // tk)

    x_spec = pl.BlockSpec((tm, tk), lambda i, j, k: (i, k))
    w_spec = pl.BlockSpec((tn, tk), lambda i, j, k: (j, k))
    row_spec = pl.BlockSpec((1, tn), lambda i, j, k: (0, j))
    out_spec = pl.BlockSpec((tm, tn), lambda i, j, k: (i, j))

    bias_f32 = bias.astype(jnp.float32)
    if masking:
        if active_units is None:
            raise ValueError("active_units is required when masking=True")
        active = (active_units != 0)
        scale = active.astype(jnp.float32).reshape(1, N)
        offset = jnp.where(active, bias_f32,
                           jnp.float32(MASK_VALUE)).reshape(1, N)
        if N_pad != N:
            scale = jnp.pad(scale, ((0, 0), (0, N_pad - N)))
            offset = jnp.pad(offset, ((0, 0), (0, N_pad - N)),
                             constant_values=MASK_VALUE)
        kernel = _linear_masked_kernel
        extra_operands = (scale, offset)
        extra_specs = [row_spec, row_spec]
    else:
        b_row = bias_f32.reshape(1, N)
        if N_pad != N:
            b_row = jnp.pad(b_row, ((0, 0), (0, N_pad - N)))
        kernel = _linear_kernel
        extra_operands = (b_row,)
        extra_specs = [row_spec]

    cost = pl.CostEstimate(
        flops=2 * B_pad * N_pad * D_pad,
        transcendentals=0,
        bytes_accessed=(B_pad * D_pad * in_sz
                        + (B_pad // tm) * N_pad * D_pad * w_sz  # weight per i-block
                        + B_pad * N_pad * out_sz
                        + n_rows * N_pad * 4))

    out = pl.pallas_call(
        kernel,
        out_shape=jax.ShapeDtypeStruct((B_pad, N_pad), out_dtype),
        grid_spec=pltpu.PrefetchScalarGridSpec(
            num_scalar_prefetch=0,
            grid=grid,
            in_specs=[x_spec, w_spec] + extra_specs,
            out_specs=out_spec,
            scratch_shapes=[pltpu.VMEM((tm, tn), jnp.float32)],
        ),
        compiler_params=pltpu.CompilerParams(
            dimension_semantics=("parallel", "parallel", "arbitrary"),
            vmem_limit_bytes=int(budget)),
        cost_estimate=cost,
    )(x, weight, *extra_operands)

    if (B_pad, N_pad) != (B, N):
        out = out[:B, :N]
    return out


# TODO(synk): adaptation() (classifier expansion + active_units bookkeeping) is
# host-side parameter/state management with no kernel equivalent; only the
# forward pass is implemented here.


if __name__ == "__main__":
    # Small shapes consistent with the module: Linear(input_dim, num_classes)
    # after one adaptation step (task=1 -> num_classes = 2 * init_class).
    batch, input_dim, init_class = 4, 32, 8
    task = 1
    num_classes = init_class * (task + 1)        # 16

    key = jax.random.PRNGKey(0)
    kx, kw, kb = jax.random.split(key, 3)

    x = jax.random.normal(kx, (batch, input_dim), dtype=jnp.float32)
    # Deterministic kaiming-normal-ish init (std = 1/sqrt(fan_in)), small bias.
    weight = (jax.random.normal(kw, (num_classes, input_dim), dtype=jnp.float32)
              * (1.0 / jnp.sqrt(jnp.float32(input_dim))))
    bias = jax.random.normal(kb, (num_classes,), dtype=jnp.float32) * 0.01

    # forward(x, task=1) marks classes [init_class, 2*init_class) active.
    active_units = jnp.zeros((num_classes,), dtype=jnp.int8)
    curr = jnp.arange(init_class * task, init_class * (task + 1))
    active_units = active_units.at[curr].set(1)

    # Reference (plain JAX, same semantics as the PyTorch forward).
    ref_lin = x @ weight.T + bias
    ref_masked = jnp.where(active_units.reshape(1, -1) == 0, MASK_VALUE, ref_lin)

    out_masked = incremental_classifier_forward(
        x, weight, bias, active_units, masking=True)
    out_plain = incremental_classifier_forward(
        x, weight, bias, masking=False)
    out_masked, out_plain = jax.block_until_ready((out_masked, out_plain))

    assert out_masked.shape == (batch, num_classes)
    assert out_plain.shape == (batch, num_classes)
    assert jnp.allclose(out_masked, ref_masked, atol=1e-5, rtol=1e-5), \
        "masked output mismatch vs reference"
    assert jnp.allclose(out_plain, ref_lin, atol=1e-5, rtol=1e-5), \
        "unmasked output mismatch vs reference"

    print("KERNEL_OK")
</pallas_src>

<mosaic_0001>
module attributes {stable_mosaic.version = 11 : i64} {
  func.func @_linear_masked_kernel(%arg0: i32, %arg1: i32, %arg2: i32, %arg3: memref<8x128xf32, #tpu.memory_space<vmem>>, %arg4: memref<128x128xf32, #tpu.memory_space<vmem>>, %arg5: memref<1x128xf32, #tpu.memory_space<vmem>>, %arg6: memref<1x128xf32, #tpu.memory_space<vmem>>, %arg7: memref<8x128xf32, #tpu.memory_space<vmem>>, %arg8: memref<8x128xf32, #tpu.memory_space<vmem>>) attributes {dimension_semantics = [#tpu.dimension_semantics<parallel>, #tpu.dimension_semantics<parallel>, #tpu.dimension_semantics<arbitrary>], iteration_bounds = array<i64: 1, 1, 1>, scalar_prefetch = 0 : i64, scratch_operands = 1 : i64, tpu.core_type = #tpu.core_type<tc>, window_params = [{transform_indices = @transform_0, window_bounds = array<i64: 8, 128>}, {transform_indices = @transform_1, window_bounds = array<i64: 128, 128>}, {transform_indices = @transform_2, window_bounds = array<i64: 1, 128>}, {transform_indices = @transform_3, window_bounds = array<i64: 1, 128>}, {transform_indices = @transform_4, window_bounds = array<i64: 8, 128>}]} {
    %c0 = arith.constant 0 : index
    %c0_0 = arith.constant 0 : index
    %0 = vector.load %arg3[%c0, %c0_0] : memref<8x128xf32, #tpu.memory_space<vmem>>, vector<8x128xf32>
    %c0_1 = arith.constant 0 : index
    %c0_2 = arith.constant 0 : index
    %1 = vector.load %arg4[%c0_1, %c0_2] : memref<128x128xf32, #tpu.memory_space<vmem>>, vector<128x128xf32>
    %cst = arith.constant dense<0.000000e+00> : vector<8x128xf32>
    %2 = tpu.matmul %0, %1, %cst {dimension_numbers = #tpu.dot_dimension_numbers<[1], [1], [0], [0], [0, 0, 1, 0], [], []>} : vector<8x128xf32>, vector<128x128xf32>, vector<8x128xf32> -> vector<8x128xf32>
    %c0_i32 = arith.constant 0 : i32
    %3 = arith.cmpi eq, %arg2, %c0_i32 : i32
    %4 = arith.extui %3 : i1 to i32
    %c0_i32_3 = arith.constant 0 : i32
    %5 = arith.cmpi ne, %4, %c0_i32_3 : i32
    scf.if %5 {
      %c0_8 = arith.constant 0 : index
      %c0_9 = arith.constant 0 : index
      %12 = vector.load %arg8[%c0_8, %c0_9] : memref<8x128xf32, #tpu.memory_space<vmem>>, vector<8x128xf32>
      tpu.vector_store %arg8[%c0_8, %c0_9], %2 {strides = array<i32>} : memref<8x128xf32, #tpu.memory_space<vmem>>, vector<8x128xf32>,
    } else {
    }
    %c0_i32_4 = arith.constant 0 : i32
    %6 = arith.cmpi sgt, %arg2, %c0_i32_4 : i32
    %7 = arith.extui %6 : i1 to i32
    %c0_i32_5 = arith.constant 0 : i32
    %8 = arith.cmpi ne, %7, %c0_i32_5 : i32
    scf.if %8 {
      %c0_8 = arith.constant 0 : index
      %c0_9 = arith.constant 0 : index
      %12 = vector.load %arg8[%c0_8, %c0_9] : memref<8x128xf32, #tpu.memory_space<vmem>>, vector<8x128xf32>
      %13 = arith.addf %12, %2 : vector<8x128xf32>
      %c0_10 = arith.constant 0 : index
      %c0_11 = arith.constant 0 : index
      %14 = vector.load %arg8[%c0_10, %c0_11] : memref<8x128xf32, #tpu.memory_space<vmem>>, vector<8x128xf32>
      tpu.vector_store %arg8[%c0_10, %c0_11], %13 {strides = array<i32>} : memref<8x128xf32, #tpu.memory_space<vmem>>, vector<8x128xf32>,
    } else {
    }
    %c0_i32_6 = arith.constant 0 : i32
    %9 = arith.cmpi eq, %arg2, %c0_i32_6 : i32
    %10 = arith.extui %9 : i1 to i32
    %c0_i32_7 = arith.constant 0 : i32
    %11 = arith.cmpi ne, %10, %c0_i32_7 : i32
    scf.if %11 {
      %c0_8 = arith.constant 0 : index
      %c0_9 = arith.constant 0 : index
      %12 = vector.load %arg8[%c0_8, %c0_9] : memref<8x128xf32, #tpu.memory_space<vmem>>, vector<8x128xf32>
      %c0_10 = arith.constant 0 : index
      %c0_11 = arith.constant 0 : index
      %13 = vector.load %arg5[%c0_10, %c0_11] : memref<1x128xf32, #tpu.memory_space<vmem>>, vector<1x128xf32>
      %14 = vector.broadcast %13 : vector<1x128xf32> to vector<8x128xf32>
      %15 = arith.mulf %12, %14 : vector<8x128xf32>
      %c0_12 = arith.constant 0 : index
      %c0_13 = arith.constant 0 : index
      %16 = vector.load %arg6[%c0_12, %c0_13] : memref<1x128xf32, #tpu.memory_space<vmem>>, vector<1x128xf32>
      %17 = vector.broadcast %16 : vector<1x128xf32> to vector<8x128xf32>
      %18 = arith.addf %15, %17 : vector<8x128xf32>
      %c0_14 = arith.constant 0 : index
      %c0_15 = arith.constant 0 : index
      %19 = vector.load %arg7[%c0_14, %c0_15] : memref<8x128xf32, #tpu.memory_space<vmem>>, vector<8x128xf32>
      tpu.vector_store %arg7[%c0_14, %c0_15], %18 {strides = array<i32>} : memref<8x128xf32, #tpu.memory_space<vmem>>, vector<8x128xf32>,
    } else {
    }
    return
  }
  func.func @transform_0(%arg0: i32, %arg1: i32, %arg2: i32) -> (i32, i32) {
    %c0_i32 = arith.constant 0 : i32
    return %arg0, %arg2 : i32, i32
  }
  func.func @transform_1(%arg0: i32, %arg1: i32, %arg2: i32) -> (i32, i32) {
    %c0_i32 = arith.constant 0 : i32
    return %arg1, %arg2 : i32, i32
  }
  func.func @transform_2(%arg0: i32, %arg1: i32, %arg2: i32) -> (i32, i32) {
    %c0_i32 = arith.constant 0 : i32
    %c0_i32_0 = arith.constant 0 : i32
    return %c0_i32, %arg1 : i32, i32
  }
  func.func @transform_3(%arg0: i32, %arg1: i32, %arg2: i32) -> (i32, i32) {
    %c0_i32 = arith.constant 0 : i32
    %c0_i32_0 = arith.constant 0 : i32
    return %c0_i32, %arg1 : i32, i32
  }
  func.func @transform_4(%arg0: i32, %arg1: i32, %arg2: i32) -> (i32, i32) {
    %c0_i32 = arith.constant 0 : i32
    return %arg0, %arg1 : i32, i32
  }
}

</mosaic_0001>

<bundles_post_ra>
// kernel: tpu_custom_call.1
= control target key start
LH: loop header
LB: loop body
LE: loop exit
PB: predicated region body
PF: predicated region fallthrough
CT: control target
= control target key end

     0   :  { %9 = vsyncpa [#allocation4], 0  ;;  %s260_s0 = inlined_call_operand.hbm [shape: f32[8,128], index: 0, kind: input, shape index: {}]   ;;  %s261_s1 = inlined_call_operand.hbm [shape: f32[128,128], index: 1, kind: input, shape index: {}]   ;;  %s262_s2 = inlined_call_operand.vmem [shape: f32[1,128], index: 2, kind: input, shape index: {}]   ;;  %s263_s3 = inlined_call_operand.vmem [shape: f32[1,128], index: 3, kind: input, shape index: {}]   ;;  %s264_s4 = inlined_call_operand.hbm [shape: f32[8,128], index: 4, kind: output, shape index: {}]  }
   0x1   :  { %10 = vsyncpa [#allocation7], 0 }
   0x2   :  { %11 = vsyncpa [#allocation5], 0  ;;  %s17_s17 = sshll.u32 %s260_s0, 4  ;;  %s215_s18 = smov [#allocation3]   ;;  %s18_s17 = int_to_ptr.hbm [resolvable:$true] %s17_s17 }
   0x3   :  { %s19_s19 = sshll.u32 %s215_s18, 4  ;;  %s27_s22 = sshll.u32 %s261_s1, 4  ;;  %s20_s19 = int_to_ptr.vmem [resolvable:$true] %s19_s19  ;;  %s28_s22 = int_to_ptr.hbm [resolvable:$true] %s27_s22 }
   0x4   :  { %22 = dma.hbm_to_vmem [thread:$0]  %s18_s17, 128, %s20_s19, [#allocation4]  }
   0x5   :  { %s216_s23 = smov [#allocation6]   ;;  %s217_s25 = smov 128  }
   0x6   :  { %s29_s24 = sshll.u32 %s216_s23, 4  ;;  %s218_s26 = smov 8   ;;  %s30_s24 = int_to_ptr.vmem [resolvable:$true] %s29_s24 }
   0x7   :  { %35 = dma.hbm_to_vmem [thread:$0]  %s28_s22, 2048, %s30_s24, [#allocation7], %s217_s25, %s217_s25, %s218_s26  }
   0x8   :  { %209 = dma.done.wait [#allocation4], 128  }
   0x9   :  { %210 = vsyncadd [#allocation4], 4294967168 }
   0xa   :  { %211 = dma.done.wait [#allocation7], 2048  }
   0xb   :  { %212 = vsyncadd [#allocation7], 4294965248  ;;  %v64_v0 = vld [vmem:[#allocation6 + $0x78] sm:$0xff]  ;;  %v63_v1 = vld [vmem:[#allocation6 + $0x70] sm:$0xff]  ;;  %s219_s29 = smov [#allocation8]   ;;  %s119_s7 = sshll.u32 %s264_s4, 4  ;;  %s120_s7 = int_to_ptr.hbm [resolvable:$true] %s119_s7 }
   0xc   :  { %65 = vmatpush.xpose.msra.mxu0 %v64_v0  ;;  %v62_v2 = vld [vmem:[#allocation6 + $0x68] sm:$0xff]  ;;  %v61_v3 = vld [vmem:[#allocation6 + $0x60] sm:$0xff]  ;;  %v60_v4 = vld [vmem:[#allocation6 + $0x58] sm:$0xff]  ;;  %s117_s30 = sshll.u32 %s219_s29, 4  ;;  %s118_s30 = int_to_ptr.vmem [resolvable:$true] %s117_s30 }
   0xd   :  { %v59_v5 = vld [vmem:[#allocation6 + $0x50] sm:$0xff]  ;;  %v58_v6 = vld [vmem:[#allocation6 + $0x48] sm:$0xff]  ;;  %v57_v7 = vld [vmem:[#allocation6 + $0x40] sm:$0xff] }
   0xe   :  { %v56_v8 = vld [vmem:[#allocation6 + $0x38] sm:$0xff]  ;;  %v55_v9 = vld [vmem:[#allocation6 + $0x30] sm:$0xff]  ;;  %v54_v10 = vld [vmem:[#allocation6 + $0x28] sm:$0xff] }
   0xf   :  { %v53_v11 = vld [vmem:[#allocation6 + $0x20] sm:$0xff]  ;;  %v52_v12 = vld [vmem:[#allocation6 + $0x18] sm:$0xff]  ;;  %v51_v13 = vld [vmem:[#allocation6 + $0x10] sm:$0xff] }
  0x10   :  { %66 = vmatpush.xpose.msra.mxu0 %v63_v1  ;;  %v50_v14 = vld [vmem:[#allocation6 + $0x8] sm:$0xff]  ;;  %v49_v15 = vld [vmem:[#allocation6] sm:$0xff]  ;;  %v48_v16 = vld [vmem:[#allocation3] sm:$0xff] }
  0x11   :  { %v135_v17 = vld [vmem:[%s262_s2] ss:$0 sm:$0xff] }
  0x12   :  { %v136_v18 = vld [vmem:[%s263_s3] ss:$0 sm:$0xff] }
  0x14   :  { %67 = vmatpush.xpose.msra.mxu0 %v62_v2 }
  0x18   :  { %68 = vmatpush.xpose.msra.mxu0 %v61_v3 }
  0x1c   :  { %69 = vmatpush.xpose.msra.mxu0 %v60_v4 }
  0x20   :  { %70 = vmatpush.xpose.msra.mxu0 %v59_v5 }
  0x24   :  { %71 = vmatpush.xpose.msra.mxu0 %v58_v6 }
  0x28   :  { %72 = vmatpush.xpose.msra.mxu0 %v57_v7 }
  0x2c   :  { %73 = vmatpush.xpose.msra.mxu0 %v56_v8 }
  0x30   :  { %74 = vmatpush.xpose.msra.mxu0 %v55_v9 }
  0x34   :  { %75 = vmatpush.xpose.msra.mxu0 %v54_v10 }
  0x38   :  { %76 = vmatpush.xpose.msra.mxu0 %v53_v11 }
  0x3c   :  { %77 = vmatpush.xpose.msra.mxu0 %v52_v12 }
  0x40   :  { %78 = vmatpush.xpose.msra.mxu0 %v51_v13 }
  0x44   :  { %79 = vmatpush.xpose.msra.mxu0 %v50_v14 }
  0x48   :  { %80 = vmatpush.xpose.msra.mxu0 %v49_v15 }
  0x4b   :  { %81 = vmatmul.f32.vlgmr.msra.gmra.mxu0 %v48_v16 }
  0xc8   :  { %v82_v19 = vpop.f32.mrf.mxu0 }
  0xc9   :  { %v105_v20 = vmul.f32 %v135_v17, %v82_v19 }
  0xcb   :  { %v110_v21 = vadd.f32 %v136_v18, %v105_v20 }
  0xcd   :  { %111 = vst [vmem:[#allocation8] sm:$0xff] %v110_v21 }
  0xce   :  { %122 = dma.vmem_to_hbm [thread:$0]  %s118_s30, 128, %s120_s7, [#allocation5]  }
  0xcf   :  { %213 = dma.done.wait [#allocation5], 128  }
  0xd0   :  { %214 = vsyncadd [#allocation5], 4294967168 }
  0xd1   :  { %127 = vsyncpa [#allocation4], 1 }
  0xd2   :  { %128 = vsyncpa [#allocation7], 1 }
  0xd3   :  { %129 = vsyncpa [#allocation5], 1 }

</bundles_post_ra>
